<compile_context>
chip_gen: v7x
topology: tpu7x:2x2x1
jax: 0.10.0
libtpu: 0.0.40
codegen_flags: <defaults>
</compile_context>

<pallas_src>
import functools

import jax
import jax.numpy as jnp
from jax.experimental import pallas as pl
from jax.experimental.pallas import tpu as pltpu


def _sce_kernel(x_ref, t_ref, out_ref, m_x, s_x, m_t, d_t, a_tx, *,
                n_rows, tile_n, n_cols, tile_c):
    i = pl.program_id(0)            # batch-tile index
    c = pl.program_id(1)            # class-tile index (reduction axis, last)
    n_c = pl.num_programs(1)

    x = x_ref[...].astype(jnp.float32)      # (tile_n, tile_c)
    t = t_ref[...].astype(jnp.float32)      # (tile_n, tile_c)

    # Ragged class tail: only generated when C % tile_c != 0 (static skip).
    if n_cols % tile_c != 0:
        col = c * tile_c + jax.lax.broadcasted_iota(jnp.int32, x.shape, 1)
        valid = col < n_cols
        neg = jnp.float32(-1e30)
        x = jnp.where(valid, x, neg)
        t = jnp.where(valid, t, neg)

    # Init running statistics at the first class block.
    @pl.when(c == 0)
    def _():
        m_x[...] = jnp.full_like(m_x, -jnp.inf)
        s_x[...] = jnp.zeros_like(s_x)
        m_t[...] = jnp.full_like(m_t, -jnp.inf)
        d_t[...] = jnp.zeros_like(d_t)
        a_tx[...] = jnp.zeros_like(a_tx)

    # --- online logsumexp over x (class axis = lanes) ---------------------
    mx_new = jnp.maximum(m_x[...], jnp.max(x, axis=-1, keepdims=True))
    corr_x = jnp.exp(m_x[...] - mx_new)
    s_x[...] = s_x[...] * corr_x + jnp.sum(jnp.exp(x - mx_new),
                                           axis=-1, keepdims=True)
    m_x[...] = mx_new

    # --- online softmax(target) statistics --------------------------------
    #   d = sum_j exp(t_j - mt),  a = sum_j exp(t_j - mt) * x_j
    #   => sum_j softmax(t)_j * x_j = a / d
    mt_new = jnp.maximum(m_t[...], jnp.max(t, axis=-1, keepdims=True))
    corr_t = jnp.exp(m_t[...] - mt_new)
    t_exp = jnp.exp(t - mt_new)
    d_t[...] = d_t[...] * corr_t + jnp.sum(t_exp, axis=-1, keepdims=True)
    a_tx[...] = a_tx[...] * corr_t + jnp.sum(t_exp * x, axis=-1, keepdims=True)
    m_t[...] = mt_new

    # Finalize once per batch block (last class step).
    @pl.when(c == n_c - 1)
    def _():
        lse = jnp.log(s_x[...]) + m_x[...]          # (tile_n, 1)
        vals = lse - a_tx[...] / d_t[...]           # (tile_n, 1)
        # Ragged batch tail: only generated when N % tile_n != 0; it touches
        # a single (tile_n, 1) vector inside the per-batch-block finalize.
        if n_rows % tile_n != 0:
            row = i * tile_n + jax.lax.broadcasted_iota(jnp.int32, vals.shape, 0)
            vals = jnp.where(row < n_rows, vals, 0.0)
        partial = jnp.sum(vals)
        # Lane-dense unmasked (8,128) store; caller reads partials[::8, 0].
        out_ref[...] = jnp.broadcast_to(partial, out_ref.shape)


def _vmem_capacity_bytes():
    try:
        return int(pltpu.get_tpu_info().vmem_capacity_bytes)
    except Exception:
        return 64 * 1024 * 1024       # conservative (v7x per-TensorCore VMEM)


def _round_up(a, b):
    return ((a + b - 1) // b) * b


def _round_down(a, b):
    return (a // b) * b


def soft_cross_entropy(inputs, targets, reduction="mean", weight=None, *,
                       tile_n=None, tile_c=None):
    """Pallas TPU soft cross entropy over (N, C) inputs/targets.
    `weight` is accepted but unused (matches the reference forward)."""
    del weight
    assert inputs.shape == targets.shape and inputs.ndim == 2
    if reduction not in ("mean", "sum"):
        raise ValueError("reduction must be 'mean' or 'sum'")
    N, C = (int(d) for d in inputs.shape)
    itemsize = jnp.dtype(inputs.dtype).itemsize

    # ----- VMEM budget (honest accounting) --------------------------------
    # 2 inputs x 2 pipeline buffers at input dtype + ~6 f32 block-sized
    # temporaries (x, t, exp(x-m), t_exp, t_exp*x, reduction partials).
    vmem_cap = _vmem_capacity_bytes()
    vmem_limit = int(min(96 * 1024 * 1024, vmem_cap // 2))   # 64 MiB v5e/v6e, 32 MiB v7x
    per_elem_bytes = 2 * 2 * itemsize + 6 * 4
    max_block_elems = max(8 * 128, (vmem_limit - (2 << 20)) // per_elem_bytes)

    # ----- Tile selection --------------------------------------------------
    # Keep >=2 batch blocks so both v7x TensorCores get work.
    row_cap = max(8, min(_round_up(N, 8), _round_up(pl.cdiv(N, 2), 8)))

    if tile_c is None:
        target_rows = min(256, row_cap)
        if C * target_rows <= max_block_elems:
            tile_c = C                                   # class axis in one block
        else:
            tile_c = max(128, _round_down(max_block_elems // target_rows, 128))
    tile_c = int(tile_c)
    if tile_c >= C:
        tile_c = C

    if tile_n is None:
        tile_n = max_block_elems // max(1, tile_c)
    tile_n = max(8, min(_round_down(int(tile_n), 8), row_cap))

    grid_n = pl.cdiv(N, tile_n)
    # Prefer an even number of batch blocks (v7x megacore load balance).
    if grid_n > 2 and grid_n % 2 == 1:
        alt = max(8, _round_up(pl.cdiv(N, grid_n + 1), 8))
        if pl.cdiv(N, alt) % 2 == 0:
            tile_n = alt
            grid_n = pl.cdiv(N, tile_n)
    grid_c = pl.cdiv(C, tile_c)

    kernel = functools.partial(_sce_kernel, n_rows=N, tile_n=tile_n,
                               n_cols=C, tile_c=tile_c)

    partials = pl.pallas_call(
        kernel,
        out_shape=jax.ShapeDtypeStruct((grid_n * 8, 128), jnp.float32),
        grid_spec=pltpu.PrefetchScalarGridSpec(
            num_scalar_prefetch=0,
            grid=(grid_n, grid_c),
            in_specs=[
                pl.BlockSpec((tile_n, tile_c), lambda i, c: (i, c)),
                pl.BlockSpec((tile_n, tile_c), lambda i, c: (i, c)),
            ],
            out_specs=pl.BlockSpec((8, 128), lambda i, c: (i, 0)),
            scratch_shapes=[pltpu.VMEM((tile_n, 1), jnp.float32)
                            for _ in range(5)],
        ),
        compiler_params=pltpu.CompilerParams(
            dimension_semantics=("parallel", "arbitrary"),
            vmem_limit_bytes=vmem_limit,
        ),
    )(inputs, targets)

    total = jnp.sum(partials[::8, 0])
    if reduction == "mean":
        return total / N
    return total


def _reference(inputs, targets, reduction):
    logprobs = jax.nn.log_softmax(inputs.astype(jnp.float32), axis=1)
    softtgt = jax.nn.softmax(targets.astype(jnp.float32), axis=1)
    vals = -(softtgt * logprobs).sum(1)
    return vals.mean() if reduction == "mean" else vals.sum()


if __name__ == "__main__":
    key = jax.random.PRNGKey(0)
    k1, k2, k3, k4, k5, k6 = jax.random.split(key, 6)

    # Case 1: even batch, single class block (N=16, C=32).
    x1 = jax.random.normal(k1, (16, 32), dtype=jnp.float32)
    t1 = jax.random.normal(k2, (16, 32), dtype=jnp.float32)
    for red in ("mean", "sum"):
        out = jax.block_until_ready(soft_cross_entropy(x1, t1, red))
        ref = _reference(x1, t1, red)
        assert jnp.allclose(out, ref, rtol=1e-5, atol=1e-5), (red, out, ref)

    # Case 2: ragged batch (N=13) exercises the batch tail mask.
    x2 = jax.random.normal(k3, (13, 32), dtype=jnp.float32)
    t2 = jax.random.normal(k4, (13, 32), dtype=jnp.float32)
    out2 = jax.block_until_ready(soft_cross_entropy(x2, t2, "mean"))
    ref2 = _reference(x2, t2, "mean")
    assert jnp.allclose(out2, ref2, rtol=1e-5, atol=1e-5), (out2, ref2)

    # Case 3: forced class tiling with a ragged class tail — exercises the
    # online-LSE accumulation path (N=16, C=320, tile_c=128 -> 3 class steps).
    x3 = jax.random.normal(k5, (16, 320), dtype=jnp.float32)
    t3 = jax.random.normal(k6, (16, 320), dtype=jnp.float32)
    out3 = jax.block_until_ready(
        soft_cross_entropy(x3, t3, "sum", tile_n=8, tile_c=128))
    ref3 = _reference(x3, t3, "sum")
    assert jnp.allclose(out3, ref3, rtol=1e-5, atol=1e-5), (out3, ref3)

    print("KERNEL_OK")
</pallas_src>

<mosaic_0001>
module attributes {stable_mosaic.version = 11 : i64} {
  func.func @_sce_kernel(%arg0: i32, %arg1: i32, %arg2: memref<8x32xf32, #tpu.memory_space<vmem>>, %arg3: memref<8x32xf32, #tpu.memory_space<vmem>>, %arg4: memref<8x128xf32, #tpu.memory_space<vmem>>, %arg5: memref<8x1xf32, #tpu.memory_space<vmem>>, %arg6: memref<8x1xf32, #tpu.memory_space<vmem>>, %arg7: memref<8x1xf32, #tpu.memory_space<vmem>>, %arg8: memref<8x1xf32, #tpu.memory_space<vmem>>, %arg9: memref<8x1xf32, #tpu.memory_space<vmem>>) attributes {dimension_semantics = [#tpu.dimension_semantics<parallel>, #tpu.dimension_semantics<arbitrary>], iteration_bounds = array<i64: 2, 1>, scalar_prefetch = 0 : i64, scratch_operands = 5 : i64, tpu.core_type = #tpu.core_type<tc>, window_params = [{transform_indices = @transform_0, window_bounds = array<i64: 8, 32>}, {transform_indices = @transform_1, window_bounds = array<i64: 8, 32>}, {transform_indices = @transform_2, window_bounds = array<i64: 8, 128>}]} {
    %c0 = arith.constant 0 : index
    %c0_0 = arith.constant 0 : index
    %0 = vector.load %arg2[%c0, %c0_0] : memref<8x32xf32, #tpu.memory_space<vmem>>, vector<8x32xf32>
    %c0_1 = arith.constant 0 : index
    %c0_2 = arith.constant 0 : index
    %1 = vector.load %arg3[%c0_1, %c0_2] : memref<8x32xf32, #tpu.memory_space<vmem>>, vector<8x32xf32>
    %c0_i32 = arith.constant 0 : i32
    %2 = arith.cmpi eq, %arg1, %c0_i32 : i32
    %3 = arith.extui %2 : i1 to i32
    %c0_i32_3 = arith.constant 0 : i32
    %4 = arith.cmpi ne, %3, %c0_i32_3 : i32
    scf.if %4 {
      %cst_34 = arith.constant 0xFF800000 : f32
      %49 = vector.broadcast %cst_34 : f32 to vector<8x1xf32>
      %c0_35 = arith.constant 0 : index
      %c0_36 = arith.constant 0 : index
      %50 = vector.load %arg5[%c0_35, %c0_36] : memref<8x1xf32, #tpu.memory_space<vmem>>, vector<8x1xf32>
      tpu.vector_store %arg5[%c0_35, %c0_36], %49 {strides = array<i32>} : memref<8x1xf32, #tpu.memory_space<vmem>>, vector<8x1xf32>,
      %cst_37 = arith.constant 0.000000e+00 : f32
      %51 = vector.broadcast %cst_37 : f32 to vector<8x1xf32>
      %c0_38 = arith.constant 0 : index
      %c0_39 = arith.constant 0 : index
      %52 = vector.load %arg6[%c0_38, %c0_39] : memref<8x1xf32, #tpu.memory_space<vmem>>, vector<8x1xf32>
      tpu.vector_store %arg6[%c0_38, %c0_39], %51 {strides = array<i32>} : memref<8x1xf32, #tpu.memory_space<vmem>>, vector<8x1xf32>,
      %cst_40 = arith.constant 0xFF800000 : f32
      %53 = vector.broadcast %cst_40 : f32 to vector<8x1xf32>
      %c0_41 = arith.constant 0 : index
      %c0_42 = arith.constant 0 : index
      %54 = vector.load %arg7[%c0_41, %c0_42] : memref<8x1xf32, #tpu.memory_space<vmem>>, vector<8x1xf32>
      tpu.vector_store %arg7[%c0_41, %c0_42], %53 {strides = array<i32>} : memref<8x1xf32, #tpu.memory_space<vmem>>, vector<8x1xf32>,
      %cst_43 = arith.constant 0.000000e+00 : f32
      %55 = vector.broadcast %cst_43 : f32 to vector<8x1xf32>
      %c0_44 = arith.constant 0 : index
      %c0_45 = arith.constant 0 : index
      %56 = vector.load %arg8[%c0_44, %c0_45] : memref<8x1xf32, #tpu.memory_space<vmem>>, vector<8x1xf32>
      tpu.vector_store %arg8[%c0_44, %c0_45], %55 {strides = array<i32>} : memref<8x1xf32, #tpu.memory_space<vmem>>, vector<8x1xf32>,
      %cst_46 = arith.constant 0.000000e+00 : f32
      %57 = vector.broadcast %cst_46 : f32 to vector<8x1xf32>
      %c0_47 = arith.constant 0 : index
      %c0_48 = arith.constant 0 : index
      %58 = vector.load %arg9[%c0_47, %c0_48] : memref<8x1xf32, #tpu.memory_space<vmem>>, vector<8x1xf32>
      tpu.vector_store %arg9[%c0_47, %c0_48], %57 {strides = array<i32>} : memref<8x1xf32, #tpu.memory_space<vmem>>, vector<8x1xf32>,
    } else {
    }
    %c0_4 = arith.constant 0 : index
    %c0_5 = arith.constant 0 : index
    %5 = vector.load %arg5[%c0_4, %c0_5] : memref<8x1xf32, #tpu.memory_space<vmem>>, vector<8x1xf32>
    %cst = arith.constant dense<0xFF800000> : vector<8xf32>
    %6 = vector.multi_reduction <maximumf>, %0, %cst [1] : vector<8x32xf32> to vector<8xf32>
    %7 = vector.shape_cast %6 : vector<8xf32> to vector<8x1xf32>
    %8 = arith.maximumf %5, %7 : vector<8x1xf32>
    %c0_6 = arith.constant 0 : index
    %c0_7 = arith.constant 0 : index
    %9 = vector.load %arg5[%c0_6, %c0_7] : memref<8x1xf32, #tpu.memory_space<vmem>>, vector<8x1xf32>
    %10 = arith.subf %9, %8 : vector<8x1xf32>
    %11 = math.exp %10 : vector<8x1xf32>
    %c0_8 = arith.constant 0 : index
    %c0_9 = arith.constant 0 : index
    %12 = vector.load %arg6[%c0_8, %c0_9] : memref<8x1xf32, #tpu.memory_space<vmem>>, vector<8x1xf32>
    %13 = arith.mulf %12, %11 : vector<8x1xf32>
    %14 = vector.broadcast %8 : vector<8x1xf32> to vector<8x32xf32>
    %15 = arith.subf %0, %14 : vector<8x32xf32>
    %16 = math.exp %15 : vector<8x32xf32>
    %cst_10 = arith.constant dense<0.000000e+00> : vector<8xf32>
    %17 = vector.multi_reduction <add>, %16, %cst_10 [1] : vector<8x32xf32> to vector<8xf32>
    %18 = vector.shape_cast %17 : vector<8xf32> to vector<8x1xf32>
    %19 = arith.addf %13, %18 : vector<8x1xf32>
    %c0_11 = arith.constant 0 : index
    %c0_12 = arith.constant 0 : index
    %20 = vector.load %arg6[%c0_11, %c0_12] : memref<8x1xf32, #tpu.memory_space<vmem>>, vector<8x1xf32>
    tpu.vector_store %arg6[%c0_11, %c0_12], %19 {strides = array<i32>} : memref<8x1xf32, #tpu.memory_space<vmem>>, vector<8x1xf32>,
    %c0_13 = arith.constant 0 : index
    %c0_14 = arith.constant 0 : index
    %21 = vector.load %arg5[%c0_13, %c0_14] : memref<8x1xf32, #tpu.memory_space<vmem>>, vector<8x1xf32>
    tpu.vector_store %arg5[%c0_13, %c0_14], %8 {strides = array<i32>} : memref<8x1xf32, #tpu.memory_space<vmem>>, vector<8x1xf32>,
    %c0_15 = arith.constant 0 : index
    %c0_16 = arith.constant 0 : index
    %22 = vector.load %arg7[%c0_15, %c0_16] : memref<8x1xf32, #tpu.memory_space<vmem>>, vector<8x1xf32>
    %cst_17 = arith.constant dense<0xFF800000> : vector<8xf32>
    %23 = vector.multi_reduction <maximumf>, %1, %cst_17 [1] : vector<8x32xf32> to vector<8xf32>
    %24 = vector.shape_cast %23 : vector<8xf32> to vector<8x1xf32>
    %25 = arith.maximumf %22, %24 : vector<8x1xf32>
    %c0_18 = arith.constant 0 : index
    %c0_19 = arith.constant 0 : index
    %26 = vector.load %arg7[%c0_18, %c0_19] : memref<8x1xf32, #tpu.memory_space<vmem>>, vector<8x1xf32>
    %27 = arith.subf %26, %25 : vector<8x1xf32>
    %28 = math.exp %27 : vector<8x1xf32>
    %29 = vector.broadcast %25 : vector<8x1xf32> to vector<8x32xf32>
    %30 = arith.subf %1, %29 : vector<8x32xf32>
    %31 = math.exp %30 : vector<8x32xf32>
    %c0_20 = arith.constant 0 : index
    %c0_21 = arith.constant 0 : index
    %32 = vector.load %arg8[%c0_20, %c0_21] : memref<8x1xf32, #tpu.memory_space<vmem>>, vector<8x1xf32>
    %33 = arith.mulf %32, %28 : vector<8x1xf32>
    %cst_22 = arith.constant dense<0.000000e+00> : vector<8xf32>
    %34 = vector.multi_reduction <add>, %31, %cst_22 [1] : vector<8x32xf32> to vector<8xf32>
    %35 = vector.shape_cast %34 : vector<8xf32> to vector<8x1xf32>
    %36 = arith.addf %33, %35 : vector<8x1xf32>
    %c0_23 = arith.constant 0 : index
    %c0_24 = arith.constant 0 : index
    %37 = vector.load %arg8[%c0_23, %c0_24] : memref<8x1xf32, #tpu.memory_space<vmem>>, vector<8x1xf32>
    tpu.vector_store %arg8[%c0_23, %c0_24], %36 {strides = array<i32>} : memref<8x1xf32, #tpu.memory_space<vmem>>, vector<8x1xf32>,
    %c0_25 = arith.constant 0 : index
    %c0_26 = arith.constant 0 : index
    %38 = vector.load %arg9[%c0_25, %c0_26] : memref<8x1xf32, #tpu.memory_space<vmem>>, vector<8x1xf32>
    %39 = arith.mulf %38, %28 : vector<8x1xf32>
    %40 = arith.mulf %31, %0 : vector<8x32xf32>
    %cst_27 = arith.constant dense<0.000000e+00> : vector<8xf32>
    %41 = vector.multi_reduction <add>, %40, %cst_27 [1] : vector<8x32xf32> to vector<8xf32>
    %42 = vector.shape_cast %41 : vector<8xf32> to vector<8x1xf32>
    %43 = arith.addf %39, %42 : vector<8x1xf32>
    %c0_28 = arith.constant 0 : index
    %c0_29 = arith.constant 0 : index
    %44 = vector.load %arg9[%c0_28, %c0_29] : memref<8x1xf32, #tpu.memory_space<vmem>>, vector<8x1xf32>
    tpu.vector_store %arg9[%c0_28, %c0_29], %43 {strides = array<i32>} : memref<8x1xf32, #tpu.memory_space<vmem>>, vector<8x1xf32>,
    %c0_30 = arith.constant 0 : index
    %c0_31 = arith.constant 0 : index
    %45 = vector.load %arg7[%c0_30, %c0_31] : memref<8x1xf32, #tpu.memory_space<vmem>>, vector<8x1xf32>
    tpu.vector_store %arg7[%c0_30, %c0_31], %25 {strides = array<i32>} : memref<8x1xf32, #tpu.memory_space<vmem>>, vector<8x1xf32>,
    %c0_i32_32 = arith.constant 0 : i32
    %46 = arith.cmpi eq, %arg1, %c0_i32_32 : i32
    %47 = arith.extui %46 : i1 to i32
    %c0_i32_33 = arith.constant 0 : i32
    %48 = arith.cmpi ne, %47, %c0_i32_33 : i32
    scf.if %48 {
      %c0_34 = arith.constant 0 : index
      %c0_35 = arith.constant 0 : index
      %49 = vector.load %arg6[%c0_34, %c0_35] : memref<8x1xf32, #tpu.memory_space<vmem>>, vector<8x1xf32>
      %50 = math.log %49 : vector<8x1xf32>
      %c0_36 = arith.constant 0 : index
      %c0_37 = arith.constant 0 : index
      %51 = vector.load %arg5[%c0_36, %c0_37] : memref<8x1xf32, #tpu.memory_space<vmem>>, vector<8x1xf32>
      %52 = arith.addf %50, %51 : vector<8x1xf32>
      %c0_38 = arith.constant 0 : index
      %c0_39 = arith.constant 0 : index
      %53 = vector.load %arg9[%c0_38, %c0_39] : memref<8x1xf32, #tpu.memory_space<vmem>>, vector<8x1xf32>
      %c0_40 = arith.constant 0 : index
      %c0_41 = arith.constant 0 : index
      %54 = vector.load %arg8[%c0_40, %c0_41] : memref<8x1xf32, #tpu.memory_space<vmem>>, vector<8x1xf32>
      %55 = arith.divf %53, %54 : vector<8x1xf32>
      %56 = arith.subf %52, %55 : vector<8x1xf32>
      %57 = vector.shape_cast %56 : vector<8x1xf32> to vector<1x8x1xf32>
      %cst_42 = arith.constant dense<0.000000e+00> : vector<1xf32>
      %58 = vector.multi_reduction <add>, %57, %cst_42 [1, 2] : vector<1x8x1xf32> to vector<1xf32>
      %59 = vector.shape_cast %58 : vector<1xf32> to vector<1x1x1xf32>
      %60 = vector.extract %59[0, 0, 0] : f32 from vector<1x1x1xf32>
      %61 = vector.broadcast %60 : f32 to vector<8x128xf32>
      %c0_43 = arith.constant 0 : index
      %c0_44 = arith.constant 0 : index
      %62 = vector.load %arg4[%c0_43, %c0_44] : memref<8x128xf32, #tpu.memory_space<vmem>>, vector<8x128xf32>
      tpu.vector_store %arg4[%c0_43, %c0_44], %61 {strides = array<i32>} : memref<8x128xf32, #tpu.memory_space<vmem>>, vector<8x128xf32>,
    } else {
    }
    return
  }
  func.func @transform_0(%arg0: i32, %arg1: i32) -> (i32, i32) {
    %c0_i32 = arith.constant 0 : i32
    return %arg0, %arg1 : i32, i32
  }
  func.func @transform_1(%arg0: i32, %arg1: i32) -> (i32, i32) {
    %c0_i32 = arith.constant 0 : i32
    return %arg0, %arg1 : i32, i32
  }
  func.func @transform_2(%arg0: i32, %arg1: i32) -> (i32, i32) {
    %c0_i32 = arith.constant 0 : i32
    %c0_i32_0 = arith.constant 0 : i32
    return %arg0, %c0_i32 : i32, i32
  }
}

</mosaic_0001>

<bundles_post_ra>
// kernel: tpu_custom_call.1
= control target key start
LH: loop header
LB: loop body
LE: loop exit
PB: predicated region body
PF: predicated region fallthrough
CT: control target
= control target key end

     0   :  { %7 = vsyncpa [#allocation8], 0  ;;  %s938_s0 = inlined_call_operand.hbm [shape: f32[16,32], index: 0, kind: input, shape index: {}]   ;;  %s939_s1 = inlined_call_operand.hbm [shape: f32[16,32], index: 1, kind: input, shape index: {}]   ;;  %s940_s2 = inlined_call_operand.hbm [shape: f32[16,128], index: 2, kind: output, shape index: {}]  }
   0x1   :  { %9 = vsyncpa [#allocation8 + $0x1], 0 }
   0x2   :  { %10 = vsyncpa [#allocation11], 0 }
   0x3   :  { %12 = vsyncpa [#allocation11 + $0x1], 0 }
   0x4   :  { %13 = vsyncpa [#allocation9], 0 }
   0x5   :  { %15 = vsyncpa [#allocation9 + $0x1], 0  ;;  %s697_s9 = smov 0   ;;  %s699_s10 = smov 0  }
   0x6   :  { %s701_s11 = smov 0   ;;  %s703_s12 = smov 0  }
   0x7   :  { %s705_s13 = smov 0   ;;  %s707_s14 = smov 0  }
   0x8 LB: > { %s426_s15 = sadd.s32 4294967295, %s674_s14   ;;  %s427_s16 = sadd.s32 4294967294, %s674_s14   ;;  %s674_s14 = sphi %s707_s14, %s21_s14   ;;  %s670_s13 = sphi %s705_s13, %s960_s13   ;;  %s666_s12 = sphi %s703_s12, %s959_s12   ;;  %s662_s11 = sphi %s701_s11, %s958_s11   ;;  %s658_s10 = sphi %s699_s10, %s957_s10   ;;  %s654_s9 = sphi %s697_s9, %s956_s9  }
   0x9   : > { %s33_s17 = sadd.s32 1, %s670_s13  ;;  %s42_s18 = sadd.s32 1, %s662_s11 }
   0xa   : > { %p35_p0 = scmp.ge.s32.totalorder %s33_s17, 2  ;;  %p49_p1 = scmp.ne.s32.totalorder %s662_s11, %s658_s10 }
   0xb   : > { %p50_p2 = scmp.eq.s32.totalorder %s674_s14, 0  ;;  %p55_p3 = scmp.ne.s32.totalorder %s658_s10, %s654_s9 }
   0xc   : > { %s962_s17 = smov (%p35_p0, %s33_s17), 0  ;;  %p56_p5 = scmp.eq.s32.totalorder %s426_s15, 0 }
   0xd   : > { %p738_p4 = por %p50_p2, %p49_p1  ;;  %s37_s20 = ssub.s32 %s670_s13, %s962_s17 }
   0xe   : > { %p107_p6 = scmp.eq.s32.totalorder %s426_s15, 1  ;;  %p40_p7 = scmp.eq.s32.totalorder %s37_s20, 0 }
   0xf   : > { %p744_p8 = por %p56_p5, %p55_p3  ;;  %p113_p10 = scmp.eq.s32.totalorder %s427_s16, 1 }
  0x10   : > { %p748_p9 = por %p107_p6, %p49_p1  ;;  %p461_p13 = scmp.lt.s32.totalorder %s674_s14, 2 }
  0x11   : > { %s944_s21 = scalar_select %p744_p8, 1, 0 }
  0x12   : > { %s945_s22 = scalar_select %p748_p9, 1, 0 }
  0x13   : > { %s753_s23 = scalar_select %p40_p7, %s662_s11, %s42_s18  }
  0x14   : > { %p755_p11 = por %p113_p10, %p55_p3  ;;  %s762_s25 = sand.u32 1, %s662_s11  }
  0x15   : > { %s430_s26 = sshll.u32 %s762_s25, 3  ;;  %s431_s27 = sshll.u32 %s670_s13, 7 }
  0x16   : > { %s946_s24 = scalar_select %p755_p11, 1, 0 }
  0x17   : > { %s771_s30 = scalar_lea.hbm %s938_s0, %s431_s27  ;;  %s137_s3 = scalar_lea.vmem [#allocation7], %s430_s26 }
  0x18   : > { %s145_s4 = sshll.u32 %s137_s3, 4  ;;  %p779_p0 = pnand %p461_p13, %p738_p4  ;;  %s775_s4 = int_to_ptr.vmem [resolvable:$true] %s145_s4 }
  0x19   : > { %s134_s6 = scalar_lea.sflag [#allocation8], %s762_s25  ;;  %s528_s7 = scalar_lea.hbm %s771_s30, 128 }
  0x1a   : > { %p529_p3 = scmp.ne.s32.totalorder %s771_s30, %s528_s7  ;;  %p530_p5 = pneg %p779_p0 }
  0x1b   : > { %s533_s16 = scalar_lea.hbm %s938_s0, 256  ;;  %p534_p4 = scmp.lt.u32.totalorder %s771_s30, %s938_s0 }
  0x1c   : > { %p531_p6 = pnand %p530_p5, %p529_p3  ;;  %p535_p10 = scmp.lt.u32.totalorder %s533_s16, %s528_s7 }
  0x1d   : > { %p537_p12 = scmp.lt.u32.totalorder %s528_s7, %s771_s30 }
  0x1e   : > { %p532_p7 = pneg %p531_p6  ;;  %p536_p13 = por %p535_p10, %p534_p4 }
  0x20   : > { %p538_p1 = por %p537_p12, %p536_p13 }
  0x22   : > { %p539_p2 = pnand %p538_p1, %p532_p7 }
  0x24   : > { %542 = shalt.err (!%p539_p2)
}
  0x25   : > { %s543_s20 = scalar_lea.vmem %s775_s4, 128  ;;  %s676_s28 = smov [#allocation7]  }
  0x26   : > { %p544_p3 = scmp.ne.s32.totalorder %s775_s4, %s543_s20  ;;  %s548_s29 = sshll.u32 %s676_s28, 4  ;;  %s549_s29 = int_to_ptr.vmem [resolvable:$false] %s548_s29 }
  0x27   : > { %s550_s3 = scalar_lea.vmem %s549_s29, 256  ;;  %p551_p9 = scmp.lt.s32.totalorder %s775_s4, %s549_s29 }
  0x28   : > { %p546_p6 = pnand %p544_p3, %p530_p5  ;;  %p552_p4 = scmp.lt.s32.totalorder %s550_s3, %s543_s20 }
  0x2a   : > { %p547_p11 = pneg %p546_p6  ;;  %p553_p10 = por %p552_p4, %p551_p9 }
  0x2c   : > { %p554_p12 = pnand %p553_p10, %p547_p11 }
  0x2e   : > { %557 = shalt.err (!%p554_p12)
}
  0x2f   : > { %453 = dma.hbm_to_vmem [thread:$0]  (!%p779_p0), %s771_s30, 128, %s775_s4, %s134_s6  }
  0x30   : > { %p948_p1 = scmp.lt.s32.totalorder %s674_s14, 3  ;;  %p949_p2 = scmp.ge.s32.totalorder %s674_s14, 1 }
  0x31   : > { %s824_s16 = scalar_lea.hbm %s939_s1, %s431_s27  ;;  %s156_s18 = scalar_lea.vmem [#allocation10], %s430_s26 }
  0x32   : > { %p815_p7 = pnand %p949_p2, %p948_p1  ;;  %s164_s19 = sshll.u32 %s156_s18, 4  ;;  %s165_s19 = int_to_ptr.vmem [resolvable:$true] %s164_s19 }
  0x33   : > { %s153_s30 = scalar_lea.sflag [#allocation11], %s762_s25  ;;  %s558_s4 = scalar_lea.hbm %s824_s16, 128 }
  0x34   : > { %s950_s7 = scalar_select %p815_p7, 1, 0 }
  0x35   : > { %p559_p9 = scmp.ne.s32.totalorder %s824_s16, %s558_s4  ;;  %s563_s27 = scalar_lea.hbm %s939_s1, 256 }
  0x36   : > { %p564_p3 = scmp.lt.u32.totalorder %s824_s16, %s939_s1  ;;  %p565_p6 = scmp.lt.u32.totalorder %s563_s27, %s558_s4 }
  0x37   : > { %p561_p11 = pnand %p559_p9, %p530_p5  ;;  %p567_p10 = scmp.lt.u32.totalorder %s558_s4, %s824_s16 }
  0x38   : > { %p566_p4 = por %p565_p6, %p564_p3 }
  0x39   : > { %p562_p13 = pneg %p561_p11 }
  0x3a   : > { %p568_p12 = por %p567_p10, %p566_p4 }
  0x3c   : > { %p569_p1 = pnand %p568_p12, %p562_p13 }
  0x3e   : > { %572 = shalt.err (!%p569_p1)
}
  0x3f   : > { %s573_s25 = scalar_lea.vmem %s165_s19, 128  ;;  %s677_s26 = smov [#allocation10]  }
  0x40   : > { %p574_p2 = scmp.ne.s32.totalorder %s165_s19, %s573_s25  ;;  %s578_s3 = sshll.u32 %s677_s26, 4  ;;  %s579_s3 = int_to_ptr.vmem [resolvable:$false] %s578_s3 }
  0x41   : > { %s580_s8 = scalar_lea.vmem %s579_s3, 256  ;;  %p581_p8 = scmp.lt.s32.totalorder %s165_s19, %s579_s3 }
  0x42   : > { %p576_p9 = pnand %p574_p2, %p530_p5  ;;  %p582_p7 = scmp.lt.s32.totalorder %s580_s8, %s573_s25 }
  0x44   : > { %p577_p11 = pneg %p576_p9  ;;  %p583_p3 = por %p582_p7, %p581_p8 }
  0x46   : > { %p584_p6 = pnand %p583_p3, %p577_p11 }
  0x48   : > { %587 = shalt.err (!%p584_p6)
}
  0x49   : > { %456 = dma.hbm_to_vmem [thread:$0]  (!%p779_p0), %s824_s16, 128, %s165_s19, %s153_s30  }
  0x4a   : > { %p951_p13 = scmp.ne.s32.totalorder %s950_s7, 0 }
  0x4b   : > { %s851_s15 = sand.u32 (!%p951_p13), 1, %s658_s10   ;;  %p952_p8 = scmp.ne.s32.totalorder (!%p951_p13), %s944_s21, 0 }
  0x4c   : > { %173 = sbr.rel (%p951_p13) target bundleno = 767 (0x2ff), region = 28  ;;  %s854_s18 = sshll.u32 (!%p951_p13), %s851_s15, 3 }
  0x4d   : > { %s176_s4 = scalar_lea.sflag (!%p951_p13), [#allocation8], %s851_s15  ;;  %s179_s6 = scalar_lea.vmem (!%p951_p13), [#allocation7], %s854_s18 }
  0x53   : > { %641 = dma.done.wait (%p952_p8), %s176_s4, 128  }
  0x54   : > { %643 = vsyncadd (%p952_p8), %s176_s4, 4294967168  ;;  %s185_s5 = scalar_lea.sflag [#allocation11], %s851_s15  ;;  %s188_s7 = scalar_lea.vmem [#allocation10], %s854_s18 }
  0x55   : > { %645 = dma.done.wait (%p952_p8), %s185_s5, 128  }
  0x56   : > { %647 = vsyncadd (%p952_p8), %s185_s5, 4294967168  ;;  %vm220_vm0 = vcmask 7168   ;;  %v678_v0 = vmov -inf   ;;  %vm227_vm1 = vcmask 261120   ;;  %v214_v1 = vld [vmem:[%s179_s6] sm:$0xff]  ;;  %v215_v2 = vld [vmem:[%s188_s7] sm:$0xff] }
  0x57   : > { %221 = vst.msk [vmem:[#allocation2] sm:$0xff] %vm220_vm0, %v678_v0  ;;  %223 = vst.msk [vmem:[#allocation4] sm:$0xff] %vm220_vm0, %v678_v0  ;;  %v228_v3 = vsel %vm227_vm1, %v214_v1, -inf  ;;  %v253_v4 = vsel %vm227_vm1, %v215_v2, -inf  ;;  %v679_v5 = vmov 0   ;;  %v680_v6 = vmov 0.0  }
  0x58   : > { %229 = vmax.xlane.f32.xlu0 %v228_v3  ;;  %514 = vset.pattern.permute.xlu1 %v679_v5  ;;  %222 = vst.msk [vmem:[#allocation3] sm:$0xff] %vm220_vm0, %v680_v6  ;;  %224 = vst.msk [vmem:[#allocation5] sm:$0xff] %vm220_vm0, %v680_v6  ;;  %s213_s21 = scalar_lea.vmem [#allocation12], %s854_s18  ;;  %s439_s19 = sshll.u32 %s666_s12, 7 }
  0x59   : > { %515 = vset.pattern.permute.xlu0 %v679_v5  ;;  %225 = vst.msk [vmem:[#allocation6] sm:$0xff] %vm220_vm0, %v680_v6  ;;  %s323_s16 = sshll.u32 %s213_s21, 4  ;;  %s891_s28 = scalar_lea.hbm %s940_s2, %s439_s19  ;;  %s886_s16 = int_to_ptr.vmem [resolvable:$true] %s323_s16 }
  0x5a   : > { %s310_s29 = scalar_lea.sflag [#allocation9], %s851_s15  ;;  %s588_s25 = scalar_lea.vmem %s886_s16, 128 }
  0x5b   : > { %p589_p0 = scmp.ne.s32.totalorder %s886_s16, %s588_s25  ;;  %p953_p5 = scmp.ne.s32.totalorder %s945_s22, 0 }
  0x5c   : > { %254 = vmax.xlane.f32.xlu0 %v253_v4  ;;  %s681_s12 = smov [#allocation12]  }
  0x5d   : > { %p590_p7 = pnand %p589_p0, %p953_p5  ;;  %s592_s26 = sshll.u32 %s681_s12, 4  ;;  %s593_s26 = int_to_ptr.vmem [resolvable:$false] %s592_s26 }
  0x5e   : > { %v226_v7 = vld [vmem:[#allocation2] sm:$0xff]  ;;  %v252_v10 = vld [vmem:[#allocation4] sm:$0xff]  ;;  %s594_s3 = scalar_lea.vmem %s593_s26, 256  ;;  %p595_p10 = scmp.lt.s32.totalorder %s886_s16, %s593_s26 }
  0x5f   : > { %v235_v30 = vld [vmem:[#allocation3] sm:$0xff]  ;;  %v268_v34 = vld [vmem:[#allocation5] sm:$0xff]  ;;  %p591_p4 = pneg %p590_p7  ;;  %p596_p12 = scmp.lt.s32.totalorder %s594_s3, %s588_s25 }
  0x60   : > { %v275_v36 = vld [vmem:[#allocation6] sm:$0xff] }
  0x61   : > { %p597_p1 = por %p596_p12, %p595_p10 }
  0x63   : > { %p598_p2 = pnand %p597_p1, %p591_p4 }
  0xe5   : > { %v230_v8 = vpop.xlane.xlu0 %229 }
  0xe6   : > { %v231_v9 = vmax.f32 %v226_v7, %v230_v8 }
  0xe8   : > { %v232_v11 = vsub.f32 %v226_v7, %v231_v9  ;;  %251 = vst.msk [vmem:[#allocation2] sm:$0xff] %vm220_vm0, %v231_v9  ;;  %239 = vperm.xlu1 %514, %v231_v9  }
  0xe9   : > { %v255_v12 = vpop.xlane.xlu0 %254 }
  0xea   : > { %v256_v13 = vmax.f32 %v252_v10, %v255_v12  ;;  %v233_v27 = vmul.f32 1.442695, %v232_v11 }
  0xec   : > { %v257_v14 = vsub.f32 %v252_v10, %v256_v13  ;;  %283 = vst.msk [vmem:[#allocation4] sm:$0xff] %vm220_vm0, %v256_v13  ;;  %262 = vperm.xlu1 %514, %v256_v13  }
  0xee   : > { %v258_v28 = vmul.f32 1.442695, %v257_v14 }
  0xef   : > { %v290_v48 = vld [vmem:[#allocation2] sm:$0xff] }
 0x167   : > { %v240_v15 = vpop.permute.xlu1 %239 }
 0x168   : > { %v242_v16 = vsub.f32 %v214_v1, %v240_v15 }
 0x16a   : > { %v243_v17 = vmul.f32 1.442695, %v242_v16 }
 0x16b   : > { %v263_v18 = vpop.permute.xlu1 %262 }
 0x16c   : > { %516 = vpow2.f32 %v243_v17  ;;  %v265_v19 = vsub.f32 %v215_v2, %v263_v18 }
 0x16e   : > { %v266_v20 = vmul.f32 1.442695, %v265_v19 }
 0x170   : > { %518 = vpow2.f32 %v266_v20 }
 0x171   : > { %520 = vpow2.f32 %v233_v27 }
 0x172   : > { %522 = vpow2.f32 %v258_v28 }
 0x176   : > { %v517_v21 = vpop.eup %516 }
 0x177   : > { %v245_v22 = vsel %vm227_vm1, %v517_v21, 0.0 }
 0x178   : > { %246 = vadd.xlane.f32.xlu0 %v245_v22 }
 0x17a   : > { %v519_v23 = vpop.eup %518 }
 0x17b   : > { %v270_v24 = vsel %vm227_vm1, %v519_v23, 0.0  ;;  %v277_v25 = vmul.f32 %v519_v23, %v214_v1  ;;  %v521_v29 = vpop.eup %520 }
 0x17c   : > { %271 = vadd.xlane.f32.xlu1 %v270_v24  ;;  %v236_v31 = vmul.f32 %v521_v29, %v235_v30  ;;  %v523_v32 = vpop.eup %522 }
 0x17d   : > { %v278_v26 = vsel %vm227_vm1, %v277_v25, 0.0  ;;  %v269_v37 = vmul.f32 %v523_v32, %v268_v34  ;;  %v276_v40 = vmul.f32 %v523_v32, %v275_v36 }
 0x17e   : > { %279 = vadd.xlane.f32.xlu0 %v278_v26 }
 0x205   : > { %v247_v33 = vpop.xlane.xlu0 %246 }
 0x206   : > { %v248_v35 = vadd.f32 %v247_v33, %v236_v31 }
 0x208   : > { %250 = vst.msk [vmem:[#allocation3] sm:$0xff] %vm220_vm0, %v248_v35 }
 0x209   : > { %v272_v38 = vpop.xlane.xlu1 %271 }
 0x20a   : > { %v273_v39 = vadd.f32 %v272_v38, %v269_v37 }
 0x20b   : > { %v280_v41 = vpop.xlane.xlu0 %279 }
 0x20c   : > { %274 = vst.msk [vmem:[#allocation5] sm:$0xff] %vm220_vm0, %v273_v39  ;;  %v281_v42 = vadd.f32 %v280_v41, %v276_v40 }
 0x20e   : > { %282 = vst.msk [vmem:[#allocation6] sm:$0xff] %vm220_vm0, %v281_v42 }
 0x20f   : > { %v287_v43 = vld [vmem:[#allocation3] sm:$0xff] }
 0x210   : > { %524 = vlog2.f32 %v287_v43 }
 0x213   : > { %v293_v44 = vld [vmem:[#allocation5] sm:$0xff] }
 0x214   : > { %526 = vrcp.f32 %v293_v44 }
 0x215   : > { %v292_v49 = vld [vmem:[#allocation6] sm:$0xff] }
 0x21a   : > { %v525_v45 = vpop.eup %524 }
 0x21b   : > { %v289_v46 = vmul.f32 0.6931472, %v525_v45 }
 0x21d   : > { %v291_v50 = vadd.f32 %v290_v48, %v289_v46 }
 0x21e   : > { %v527_v47 = vpop.eup %526 }
 0x21f   : > { %v295_v51 = vmul.f32 %v527_v47, %v292_v49 }
 0x221   : > { %v296_v52 = vsub.f32 %v291_v50, %v295_v51 }
 0x223   : > { %v297_v53 = vsel %vm220_vm0, %v296_v52, 0.0 }
 0x224   : > { %298 = vadd.xlane.f32.xlu0 %v297_v53 }
 0x2b1   : > { %v299_v54 = vpop.xlane.xlu0 %298 }
 0x2b2   : > { %v300_v55 = vrot.slane %v299_v54, 4 }
 0x2b4   : > { %v301_v56 = vadd.f32 %v300_v55, %v299_v54 }
 0x2b6   : > { %v302_v57 = vrot.slane %v301_v56, 2 }
 0x2b8   : > { %v303_v58 = vadd.f32 %v302_v57, %v301_v56 }
 0x2ba   : > { %v304_v59 = vrot.slane %v303_v58, 1 }
 0x2bc   : > { %v305_v60 = vadd.f32 %v304_v59, %v303_v58 }
 0x2be   : > { %442 = vpush %v305_v60 }
 0x2ef   : > { %s443_s30 = spop %442 }
 0x2f0   : > { %v307_v61 = vstv %s443_s30 }
 0x2f1   : > { %308 = vst [vmem:[%s213_s21] sm:$0xff] %v307_v61 }
 0x2f2   : > { %601 = shalt.err (!%p598_p2)
}
 0x2f3   : > { %s602_s8 = scalar_lea.hbm %s891_s28, 128  ;;  %s606_s4 = scalar_lea.hbm %s940_s2, 256 }
 0x2f4   : > { %p603_p9 = scmp.ne.s32.totalorder %s891_s28, %s602_s8  ;;  %p607_p6 = scmp.lt.u32.totalorder %s891_s28, %s940_s2 }
 0x2f5   : > { %p608_p13 = scmp.lt.u32.totalorder %s606_s4, %s602_s8  ;;  %p610_p0 = scmp.lt.u32.totalorder %s602_s8, %s891_s28 }
 0x2f6   : > { %p604_p11 = pnand %p603_p9, %p953_p5 }
 0x2f7   : > { %p609_p8 = por %p608_p13, %p607_p6 }
 0x2f8   : > { %p605_p3 = pneg %p604_p11 }
 0x2f9   : > { %p611_p7 = por %p610_p0, %p609_p8 }
 0x2fb   : > { %p612_p4 = pnand %p611_p7, %p605_p3 }
 0x2fd   : > { %615 = shalt.err (!%p612_p4)
}
 0x2fe   : > { %448 = dma.vmem_to_hbm [thread:$0]  (%p953_p5), %s886_s16, 128, %s891_s28, %s310_s29  }
 0x2ff PF: > { %s335_s7 = sand.u32 1, %s654_s9   ;;  %p954_p10 = scmp.ne.s32.totalorder %s946_s24, 0 }
 0x300   : > { %p955_p12 = scmp.ge.s32.totalorder %s674_s14, 2  ;;  %s336_s21 = scalar_lea.sflag [#allocation9], %s335_s7 }
 0x302   : > { %p458_p1 = pnand %p955_p12, %p954_p10 }
 0x304   : > { %649 = dma.done.wait (!%p458_p1), %s336_s21, 128  }
 0x305   : > { %651 = vsyncadd (!%p458_p1), %s336_s21, 4294967168  ;;  %s21_s14 = sadd.s32 1, %s674_s14   ;;  %s956_s9 = smov %s658_s10 }
 0x306   : > { %p18_p2 = scmp.ge.s32.totalorder %s21_s14, 4   ;;  %s957_s10 = smov %s662_s11 }
 0x307   : > { %s958_s11 = smov %s753_s23  ;;  %s959_s12 = smov %s670_s13 }
 0x308   : > { %s960_s13 = smov %s962_s17  ;;  %20 = sbr.rel (!%p18_p2) target bundleno = 8 (0x8), region = 94 }
 0x30f   :  { %341 = vsyncpa [#allocation8], 1 }
 0x310   :  { %343 = vsyncpa [#allocation8 + $0x1], 1 }
 0x311   :  { %344 = vsyncpa [#allocation11], 1 }
 0x312   :  { %346 = vsyncpa [#allocation11 + $0x1], 1 }
 0x313   :  { %347 = vsyncpa [#allocation9], 1 }
 0x314   :  { %349 = vsyncpa [#allocation9 + $0x1], 1 }

</bundles_post_ra>
